<compile_context>
chip_gen: v7x
topology: tpu7x:2x2x1
jax: 0.10.0
libtpu: 0.0.40
codegen_flags: <defaults>
</compile_context>

<pallas_src>
import functools

import jax
import jax.numpy as jnp
from jax.experimental import pallas as pl
from jax.experimental.pallas import tpu as pltpu


def _round_up(x, m):
    return ((x + m - 1) // m) * m


def _mlp_decoder_kernel(z_ref, wcat_ref, bcat_ref, w2_ref, b2_ref,
                        matz_ref, out_ref, *, split):
    # z_ref    : (TB, dN)       lane-dense batch tile (compute dtype)
    # wcat_ref : (dN, dN+dH)    [kron(adj^T, I_n) | kron(adj^T, W1^T)]
    # bcat_ref : (1, dN+dH)     [folded Wa offset | folded fc1 bias]   (f32)
    # w2_ref   : (dH, dO)       kron(I_d, W2^T)
    # b2_ref   : (1, dO)        tiled b2                               (f32)
    # matz_ref : (TB, dN)       mat_z slab (f32)
    # out_ref  : (TB, dO)       out slab   (f32)
    z = z_ref[...]

    # One MXU pass produces both mat_z and the pre-ReLU hidden activations.
    # `split` is a multiple of 128 for the intended shapes, so the column
    # slices land on lane-tile boundaries (no data movement).
    y = jnp.dot(z, wcat_ref[...], preferred_element_type=jnp.float32)
    y = y + bcat_ref[...]

    matz_ref[...] = y[:, :split].astype(matz_ref.dtype)

    h3 = jnp.maximum(y[:, split:], 0.0).astype(w2_ref.dtype)      # ReLU (f32)
    out = jnp.dot(h3, w2_ref[...], preferred_element_type=jnp.float32)
    out_ref[...] = (out + b2_ref[...]).astype(out_ref.dtype)


def mlp_decoder_forward(inputs, input_z, n_in_node, rel_rec, rel_send,
                        origin_A, adj_A_tilt, Wa, params, *,
                        block_b=None, compute_dtype=jnp.float32,
                        vmem_budget_bytes=20 * 1024 * 1024):
    """JAX/Pallas equivalent of MLPDecoder.forward (eval mode, dropout=0)."""
    del inputs, n_in_node, rel_rec, rel_send  # unused by the reference forward

    d = origin_A.shape[0]
    B, _, n_in_z = input_z.shape
    w1, b1, w2, b2 = params["w1"], params["b1"], params["w2"], params["b2"]
    n_hid = w1.shape[0]
    n_out = w2.shape[0]
    out_dtype = input_z.dtype
    f32 = jnp.float32

    # TODO(synk): the dense (d x d) matrix inverse (preprocess_adj_new1) has no
    # Pallas primitive; it is a tiny one-time preprocessing op done in XLA.
    adj_new1 = jnp.linalg.inv(
        jnp.eye(d, dtype=origin_A.dtype) - origin_A.T).astype(f32)

    dN, dH, dO = d * n_in_z, d * n_hid, d * n_out
    dcat = dN + dH

    # ---- Kron-lift + fuse the per-node operators (wrapper-side, constant) ---
    eye_n = jnp.eye(n_in_z, dtype=f32)
    eye_d = jnp.eye(d, dtype=f32)
    adjT = adj_new1.T
    w1f = w1.astype(f32)
    w2f = w2.astype(f32)

    a1_big = jnp.kron(adjT, eye_n)                    # (dN, dN)
    aw1_big = jnp.kron(adjT, w1f.T)                   # (dN, dH) == a1_big @ kron(I_d, W1^T)
    w2_big = jnp.kron(eye_d, w2f.T)                   # (dH, dO)

    # Fold Wa:  adj @ (z + Wa) - Wa == adj @ z + c,
    #           c = rowsum(adj)[:, None] * Wa - Wa            (broadcast over
    # the last z dimension, i.e. assumes n_out == n_in_z as in DAG-GNN).
    wa = jnp.broadcast_to(jnp.asarray(Wa, dtype=f32), (n_in_z,))
    c2d = jnp.sum(adj_new1, axis=1, keepdims=True) * wa[None, :] - wa[None, :]
    c = c2d.reshape(1, dN)                            # (1, dN)
    # Fold c through fc1 as well:  (z@a1 + c)@kron(I,W1^T) + b1
    b1_fold = (c2d @ w1f.T + b1.astype(f32)[None, :]).reshape(1, dH)
    b2_big = jnp.tile(b2.astype(f32), d).reshape(1, dO)

    wcat = jnp.concatenate([a1_big, aw1_big], axis=1).astype(compute_dtype)
    bcat = jnp.concatenate([c, b1_fold], axis=1)      # f32
    w2_big = w2_big.astype(compute_dtype)

    # Lane-dense input slab (B, d*n_in_z).
    z_flat = input_z.reshape(B, dN).astype(compute_dtype)

    # ---- Batch tiling: single-step grid when it fits the VMEM budget --------
    in_item = jnp.dtype(compute_dtype).itemsize
    sub = 16 if in_item == 2 else 8                   # min sublane tile

    per_row = (2 * dN * in_item                       # z tile (double-buffered)
               + 2 * dN * 4 + 2 * dO * 4              # mat_z / out slabs (x2)
               + (dcat + dH + dO) * 4)                # in-kernel f32 temporaries
    weight_bytes = 2 * ((dN * dcat + dH * dO) * in_item + (dcat + dO) * 4)
    rows_fit = max(sub,
                   ((vmem_budget_bytes - weight_bytes) // max(per_row, 1))
                   // sub * sub)

    b_min = _round_up(B, sub)
    if block_b is None:
        tb = b_min if b_min <= rows_fit else min(512, rows_fit)
    else:
        tb = min(_round_up(min(int(block_b), B), sub), rows_fit)
    tb = max(sub, int(tb))
    b_pad = _round_up(B, tb)
    grid = (b_pad // tb,)

    if b_pad != B:
        z_flat = jnp.pad(z_flat, ((0, b_pad - B), (0, 0)))

    # Advisory cost estimate so XLA can overlap this latency-bound call with
    # the surrounding preprocessing (inverse + kron construction).
    flops = 2 * b_pad * dN * dcat + 2 * b_pad * dH * dO
    bytes_accessed = (b_pad * dN * in_item + b_pad * (dN + dO) * 4
                      + (dN * dcat + dH * dO) * in_item + (dcat + dO) * 4)
    cost = pl.CostEstimate(flops=int(flops), transcendentals=0,
                           bytes_accessed=int(bytes_accessed))

    kernel = functools.partial(_mlp_decoder_kernel, split=dN)

    matz_flat, out_flat = pl.pallas_call(
        kernel,
        out_shape=(jax.ShapeDtypeStruct((b_pad, dN), out_dtype),
                   jax.ShapeDtypeStruct((b_pad, dO), out_dtype)),
        grid_spec=pltpu.PrefetchScalarGridSpec(
            num_scalar_prefetch=0,
            grid=grid,
            in_specs=[
                pl.BlockSpec((tb, dN), lambda i: (i, 0)),    # z tile (streamed)
                pl.BlockSpec((dN, dcat), lambda i: (0, 0)),  # [A1 | A1@W1^T]
                pl.BlockSpec((1, dcat), lambda i: (0, 0)),   # folded biases
                pl.BlockSpec((dH, dO), lambda i: (0, 0)),    # kron W2^T
                pl.BlockSpec((1, dO), lambda i: (0, 0)),     # tiled b2
            ],
            out_specs=[
                pl.BlockSpec((tb, dN), lambda i: (i, 0)),    # mat_z slab
                pl.BlockSpec((tb, dO), lambda i: (i, 0)),    # out slab
            ],
        ),
        compiler_params=pltpu.CompilerParams(
            dimension_semantics=("parallel",),
            vmem_limit_bytes=32 * 1024 * 1024),
        cost_estimate=cost,
    )(z_flat, wcat, bcat, w2_big, b2_big)

    mat_z = matz_flat[:B].reshape(B, d, n_in_z)
    out = out_flat[:B].reshape(B, d, n_out)
    return mat_z, out, adj_A_tilt


def _xavier_normal(key, shape):
    fan_out, fan_in = shape
    std = (2.0 / (fan_in + fan_out)) ** 0.5
    return std * jax.random.normal(key, shape, dtype=jnp.float32)


def _reference_forward(input_z, origin_A, Wa, params):
    d = origin_A.shape[0]
    adj_new1 = jnp.linalg.inv(jnp.eye(d, dtype=origin_A.dtype) - origin_A.T)
    mat_z = jnp.einsum("ij,bjk->bik", adj_new1, input_z + Wa) - Wa
    h3 = jax.nn.relu(mat_z @ params["w1"].T + params["b1"])
    out = h3 @ params["w2"].T + params["b2"]
    return mat_z, out


if __name__ == "__main__":
    # Small shapes consistent with MLPDecoder(n_in_z, n_hid, n_out).
    B = 50               # batch (exercises sublane padding)
    d = 8                # data_variable_size (number of nodes)
    n_in_z = 16          # latent dim of z
    n_hid = 32
    n_out = 16           # n_out == n_in_z in the DAG-GNN setup
    n_in_node = 1

    key = jax.random.PRNGKey(0)
    k_z, k_a, k_wa, k_w1, k_b1, k_w2, k_b2 = jax.random.split(key, 7)

    input_z = jax.random.normal(k_z, (B, d, n_in_z), dtype=jnp.float32)
    origin_A = 0.1 * jax.random.normal(k_a, (d, d), dtype=jnp.float32)
    adj_A_tilt = jnp.eye(d, dtype=jnp.float32)
    Wa = 0.1 * jax.random.normal(k_wa, (n_out,), dtype=jnp.float32)

    # nn.Linear params (PyTorch (out_features, in_features) layout); small
    # nonzero biases exercise the folded-bias path.
    params = {
        "w1": _xavier_normal(k_w1, (n_hid, n_in_z)),
        "b1": 0.05 * jax.random.normal(k_b1, (n_hid,), dtype=jnp.float32),
        "w2": _xavier_normal(k_w2, (n_out, n_hid)),
        "b2": 0.05 * jax.random.normal(k_b2, (n_out,), dtype=jnp.float32),
    }

    # Unused-by-forward arguments (kept for signature parity).
    inputs = jnp.zeros((B, d, n_in_node), dtype=jnp.float32)
    rel_rec = jnp.zeros((d * (d - 1), d), dtype=jnp.float32)
    rel_send = jnp.zeros((d * (d - 1), d), dtype=jnp.float32)

    ref_mat_z, ref_out = _reference_forward(input_z, origin_A, Wa, params)

    # 1) f32, auto tiling -> whole batch in a single grid step.
    mat_z, out, adj_tilt_out = mlp_decoder_forward(
        inputs, input_z, n_in_node, rel_rec, rel_send,
        origin_A, adj_A_tilt, Wa, params)
    jax.block_until_ready((mat_z, out, adj_tilt_out))
    assert mat_z.shape == ref_mat_z.shape and out.shape == ref_out.shape
    assert jnp.allclose(mat_z, ref_mat_z, atol=2e-4, rtol=2e-4)
    assert jnp.allclose(out, ref_out, atol=2e-4, rtol=2e-4)
    assert jnp.array_equal(adj_tilt_out, adj_A_tilt)

    # 2) Explicit 2-step "parallel" grid (v7x-style split across TensorCores).
    mat_z2, out2, _ = mlp_decoder_forward(
        inputs, input_z, n_in_node, rel_rec, rel_send,
        origin_A, adj_A_tilt, Wa, params, block_b=32)
    jax.block_until_ready((mat_z2, out2))
    assert jnp.allclose(mat_z2, ref_mat_z, atol=2e-4, rtol=2e-4)
    assert jnp.allclose(out2, ref_out, atol=2e-4, rtol=2e-4)

    # 3) bf16 MXU feed (f32 accumulation / outputs) — looser tolerance.
    mat_z3, out3, _ = mlp_decoder_forward(
        inputs, input_z, n_in_node, rel_rec, rel_send,
        origin_A, adj_A_tilt, Wa, params, compute_dtype=jnp.bfloat16)
    jax.block_until_ready((mat_z3, out3))
    assert jnp.allclose(mat_z3, ref_mat_z, atol=1e-1, rtol=1e-1)
    assert jnp.allclose(out3, ref_out, atol=1e-1, rtol=1e-1)

    print("KERNEL_OK")
</pallas_src>

<mosaic_0001>
module attributes {stable_mosaic.version = 11 : i64} {
  func.func @_mlp_decoder_kernel(%arg0: i32, %arg1: memref<56x128xf32, #tpu.memory_space<vmem>>, %arg2: memref<128x384xf32, #tpu.memory_space<vmem>>, %arg3: memref<1x384xf32, #tpu.memory_space<vmem>>, %arg4: memref<256x128xf32, #tpu.memory_space<vmem>>, %arg5: memref<1x128xf32, #tpu.memory_space<vmem>>, %arg6: memref<56x128xf32, #tpu.memory_space<vmem>>, %arg7: memref<56x128xf32, #tpu.memory_space<vmem>>) attributes {dimension_semantics = [#tpu.dimension_semantics<parallel>], iteration_bounds = array<i64: 1>, scalar_prefetch = 0 : i64, scratch_operands = 0 : i64, tpu.core_type = #tpu.core_type<tc>, window_params = [{transform_indices = @transform_0, window_bounds = array<i64: 56, 128>}, {pipeline_mode = #tpu.pipeline_mode<synchronous>, transform_indices = @transform_1, window_bounds = array<i64: 128, 384>}, {pipeline_mode = #tpu.pipeline_mode<synchronous>, transform_indices = @transform_2, window_bounds = array<i64: 1, 384>}, {pipeline_mode = #tpu.pipeline_mode<synchronous>, transform_indices = @transform_3, window_bounds = array<i64: 256, 128>}, {pipeline_mode = #tpu.pipeline_mode<synchronous>, transform_indices = @transform_4, window_bounds = array<i64: 1, 128>}, {transform_indices = @transform_5, window_bounds = array<i64: 56, 128>}, {transform_indices = @transform_6, window_bounds = array<i64: 56, 128>}]} {
    %c0 = arith.constant 0 : index
    %c0_0 = arith.constant 0 : index
    %0 = vector.load %arg1[%c0, %c0_0] : memref<56x128xf32, #tpu.memory_space<vmem>>, vector<56x128xf32>
    %c0_1 = arith.constant 0 : index
    %c0_2 = arith.constant 0 : index
    %1 = vector.load %arg2[%c0_1, %c0_2] : memref<128x384xf32, #tpu.memory_space<vmem>>, vector<128x384xf32>
    %cst = arith.constant dense<0.000000e+00> : vector<56x384xf32>
    %2 = tpu.matmul %0, %1, %cst {dimension_numbers = #tpu.dot_dimension_numbers<[1], [0], [0], [1], [0, 0, 1, 1], [], []>} : vector<56x128xf32>, vector<128x384xf32>, vector<56x384xf32> -> vector<56x384xf32>
    %c0_3 = arith.constant 0 : index
    %c0_4 = arith.constant 0 : index
    %3 = vector.load %arg3[%c0_3, %c0_4] : memref<1x384xf32, #tpu.memory_space<vmem>>, vector<1x384xf32>
    %4 = vector.broadcast %3 : vector<1x384xf32> to vector<56x384xf32>
    %5 = arith.addf %2, %4 : vector<56x384xf32>
    %6 = vector.extract_strided_slice %5 {offsets = [0, 0], sizes = [56, 128], strides = [1, 1]} : vector<56x384xf32> to vector<56x128xf32>
    %c0_5 = arith.constant 0 : index
    %c0_6 = arith.constant 0 : index
    %7 = vector.load %arg6[%c0_5, %c0_6] : memref<56x128xf32, #tpu.memory_space<vmem>>, vector<56x128xf32>
    tpu.vector_store %arg6[%c0_5, %c0_6], %6 {strides = array<i32>} : memref<56x128xf32, #tpu.memory_space<vmem>>, vector<56x128xf32>,
    %8 = vector.extract_strided_slice %5 {offsets = [0, 128], sizes = [56, 256], strides = [1, 1]} : vector<56x384xf32> to vector<56x256xf32>
    %cst_7 = arith.constant 0.000000e+00 : f32
    %9 = vector.broadcast %cst_7 : f32 to vector<56x256xf32>
    %10 = arith.maximumf %8, %9 : vector<56x256xf32>
    %c0_8 = arith.constant 0 : index
    %c0_9 = arith.constant 0 : index
    %11 = vector.load %arg4[%c0_8, %c0_9] : memref<256x128xf32, #tpu.memory_space<vmem>>, vector<256x128xf32>
    %cst_10 = arith.constant dense<0.000000e+00> : vector<56x128xf32>
    %12 = tpu.matmul %10, %11, %cst_10 {dimension_numbers = #tpu.dot_dimension_numbers<[1], [0], [0], [1], [0, 0, 1, 1], [], []>} : vector<56x256xf32>, vector<256x128xf32>, vector<56x128xf32> -> vector<56x128xf32>
    %c0_11 = arith.constant 0 : index
    %c0_12 = arith.constant 0 : index
    %13 = vector.load %arg5[%c0_11, %c0_12] : memref<1x128xf32, #tpu.memory_space<vmem>>, vector<1x128xf32>
    %14 = vector.broadcast %13 : vector<1x128xf32> to vector<56x128xf32>
    %15 = arith.addf %12, %14 : vector<56x128xf32>
    %c0_13 = arith.constant 0 : index
    %c0_14 = arith.constant 0 : index
    %16 = vector.load %arg7[%c0_13, %c0_14] : memref<56x128xf32, #tpu.memory_space<vmem>>, vector<56x128xf32>
    tpu.vector_store %arg7[%c0_13, %c0_14], %15 {strides = array<i32>} : memref<56x128xf32, #tpu.memory_space<vmem>>, vector<56x128xf32>,
    return
  }
  func.func @transform_0(%arg0: i32) -> (i32, i32) {
    %c0_i32 = arith.constant 0 : i32
    %c0_i32_0 = arith.constant 0 : i32
    return %arg0, %c0_i32 : i32, i32
  }
  func.func @transform_1(%arg0: i32) -> (i32, i32) {
    %c0_i32 = arith.constant 0 : i32
    %c0_i32_0 = arith.constant 0 : i32
    %c0_i32_1 = arith.constant 0 : i32
    return %c0_i32, %c0_i32_0 : i32, i32
  }
  func.func @transform_2(%arg0: i32) -> (i32, i32) {
    %c0_i32 = arith.constant 0 : i32
    %c0_i32_0 = arith.constant 0 : i32
    %c0_i32_1 = arith.constant 0 : i32
    return %c0_i32, %c0_i32_0 : i32, i32
  }
  func.func @transform_3(%arg0: i32) -> (i32, i32) {
    %c0_i32 = arith.constant 0 : i32
    %c0_i32_0 = arith.constant 0 : i32
    %c0_i32_1 = arith.constant 0 : i32
    return %c0_i32, %c0_i32_0 : i32, i32
  }
  func.func @transform_4(%arg0: i32) -> (i32, i32) {
    %c0_i32 = arith.constant 0 : i32
    %c0_i32_0 = arith.constant 0 : i32
    %c0_i32_1 = arith.constant 0 : i32
    return %c0_i32, %c0_i32_0 : i32, i32
  }
  func.func @transform_5(%arg0: i32) -> (i32, i32) {
    %c0_i32 = arith.constant 0 : i32
    %c0_i32_0 = arith.constant 0 : i32
    return %arg0, %c0_i32 : i32, i32
  }
  func.func @transform_6(%arg0: i32) -> (i32, i32) {
    %c0_i32 = arith.constant 0 : i32
    %c0_i32_0 = arith.constant 0 : i32
    return %arg0, %c0_i32 : i32, i32
  }
}

</mosaic_0001>

<bundles_post_ra>
// kernel: tpu_custom_call.1
= control target key start
LH: loop header
LB: loop body
LE: loop exit
PB: predicated region body
PF: predicated region fallthrough
CT: control target
= control target key end

     0   :  { %12 = vsyncpa [#allocation3], 0  ;;  %s1090_s0 = inlined_call_operand.hbm [shape: f32[56,128], index: 0, kind: input, shape index: {}]   ;;  %s1091_s1 = inlined_call_operand.hbm [shape: f32[128,384], index: 1, kind: input, shape index: {}]   ;;  %s1092_s2 = inlined_call_operand.vmem [shape: f32[1,384], index: 2, kind: input, shape index: {}]   ;;  %s1093_s3 = inlined_call_operand.hbm [shape: f32[256,128], index: 3, kind: input, shape index: {}]   ;;  %s1094_s4 = inlined_call_operand.vmem [shape: f32[1,128], index: 4, kind: input, shape index: {}]   ;;  %s1095_s5 = inlined_call_operand.hbm [shape: f32[56,128], index: 5, kind: output, shape index: {0}]   ;;  %s1096_s6 = inlined_call_operand.hbm [shape: f32[56,128], index: 6, kind: output, shape index: {1}]  }
   0x1   :  { %13 = vsyncpa [#allocation6], 0 }
   0x2   :  { %14 = vsyncpa [#allocation4], 0 }
   0x3   :  { %15 = vsyncpa [#allocation10], 0  ;;  %s909_s21 = smov [#allocation5]   ;;  %s791_s25 = scalar_lea.hbm %s1091_s1, 6144 }
   0x4   :  { %s33_s22 = sshll.u32 %s909_s21, 4  ;;  %p792_p0 = scmp.ne.s32.totalorder %s1091_s1, %s791_s25  ;;  %s34_s22 = int_to_ptr.vmem [resolvable:$true] %s33_s22 }
   0x5   :  { %p795_p1 = scmp.lt.u32.totalorder %s791_s25, %s1091_s1 }
   0x7   :  { %p797_p2 = pnand %p795_p1, %p792_p0 }
   0x9   :  { %800 = shalt.err (!%p797_p2)
}
   0xa   :  { %s801_s30 = scalar_lea.vmem %s34_s22, 6144  ;;  %p806_p4 = scmp.lt.s32.totalorder %s34_s22, %s34_s22 }
   0xb   :  { %p802_p3 = scmp.ne.s32.totalorder %s34_s22, %s801_s30  ;;  %p807_p5 = scmp.lt.s32.totalorder %s801_s30, %s801_s30 }
   0xd   :  { %p808_p6 = por %p807_p5, %p806_p4 }
   0xf   :  { %p809_p7 = pnand %p808_p6, %p802_p3 }
  0x11   :  { %812 = shalt.err (!%p809_p7)
}
  0x12   :  { %s910_s7 = smov 384   ;;  %s911_s8 = smov 24  }
  0x13   :  { %39 = dma.hbm_to_vmem [thread:$0]  %s1091_s1, 6144, %s34_s22, [#allocation6], %s910_s7, %s910_s7, %s911_s8  }
  0x14   :  { %s912_s11 = smov [#allocation2]   ;;  %s813_s15 = scalar_lea.hbm %s1090_s0, 896 }
  0x15   :  { %s21_s12 = sshll.u32 %s912_s11, 4  ;;  %p814_p8 = scmp.ne.s32.totalorder %s1090_s0, %s813_s15  ;;  %s22_s12 = int_to_ptr.vmem [resolvable:$true] %s21_s12 }
  0x16   :  { %p817_p9 = scmp.lt.u32.totalorder %s813_s15, %s1090_s0 }
  0x18   :  { %p819_p10 = pnand %p817_p9, %p814_p8 }
  0x1a   :  { %822 = shalt.err (!%p819_p10)
}
  0x1b   :  { %s823_s20 = scalar_lea.vmem %s22_s12, 896  ;;  %p828_p12 = scmp.lt.s32.totalorder %s22_s12, %s22_s12 }
  0x1c   :  { %p824_p11 = scmp.ne.s32.totalorder %s22_s12, %s823_s20  ;;  %p829_p13 = scmp.lt.s32.totalorder %s823_s20, %s823_s20 }
  0x1e   :  { %p830_p0 = por %p829_p13, %p828_p12 }
  0x20   :  { %p831_p1 = pnand %p830_p0, %p824_p11 }
  0x22   :  { %834 = shalt.err (!%p831_p1)
}
  0x23   :  { %s913_s1 = smov 128   ;;  %s914_s21 = smov 8  }
  0x24   :  { %27 = dma.hbm_to_vmem [thread:$0]  %s1090_s0, 896, %s22_s12, [#allocation3], %s913_s1, %s913_s1, %s914_s21  }
  0x25   :  { %s915_s24 = smov [#allocation7]   ;;  %s835_s28 = scalar_lea.hbm %s1093_s3, 4096 }
  0x26   :  { %s47_s25 = sshll.u32 %s915_s24, 4  ;;  %p836_p2 = scmp.ne.s32.totalorder %s1093_s3, %s835_s28  ;;  %s48_s25 = int_to_ptr.vmem [resolvable:$true] %s47_s25 }
  0x27   :  { %p839_p3 = scmp.lt.u32.totalorder %s835_s28, %s1093_s3 }
  0x29   :  { %p841_p4 = pnand %p839_p3, %p836_p2 }
  0x2b   :  { %844 = shalt.err (!%p841_p4)
}
  0x2c   :  { %s845_s9 = scalar_lea.vmem %s48_s25, 4096  ;;  %p850_p6 = scmp.lt.s32.totalorder %s48_s25, %s48_s25 }
  0x2d   :  { %p846_p5 = scmp.ne.s32.totalorder %s48_s25, %s845_s9  ;;  %p851_p7 = scmp.lt.s32.totalorder %s845_s9, %s845_s9 }
  0x2f   :  { %p852_p8 = por %p851_p7, %p850_p6 }
  0x31   :  { %p853_p9 = pnand %p852_p8, %p846_p5 }
  0x33   :  { %856 = shalt.err (!%p853_p9)
}
  0x34   :  { %53 = dma.hbm_to_vmem [thread:$0]  %s1093_s3, 4096, %s48_s25, [#allocation6], %s913_s1, %s913_s1, %s914_s21  }
  0x35   :  { %901 = dma.done.wait [#allocation3], 896  }
  0x36   :  { %902 = vsyncadd [#allocation3], 4294966400 }
  0x37   :  { %903 = dma.done.wait [#allocation6], 10240  }
  0x38   :  { %904 = vsyncadd [#allocation6], 4294957056  ;;  %v916_v0 = vmov 0.0|0.0   ;;  %vm917_vm0 = vmmov 0   ;;  %v918_v1 = vmov 0.0   ;;  %v73_v2 = vld [vmem:[#allocation5 + $0x8] sm:$0xff] }
  0x39   :  { %707 = vmatprep.subr.bf16.mxu1 %v916_v0  ;;  %654 = vmatprep.mubr.msk.f32.mxu1 %vm917_vm0, %v918_v1  ;;  %v76_v3 = vld [vmem:[#allocation5 + $0x20] sm:$0xff]  ;;  %v74_v4 = vld [vmem:[#allocation5 + $0x10] sm:$0xff]  ;;  %v77_v6 = vld [vmem:[#allocation5 + $0x28] sm:$0xff] }
  0x3a   :  { %201 = vmatprep.mubr.f32.mxu0 %v918_v1  ;;  %v675_v5 = vpack.c.bf16 %v76_v3, %v73_v2  ;;  %v72_v7 = vld [vmem:[#allocation5] sm:$0xff]  ;;  %v75_v8 = vld [vmem:[#allocation5 + $0x18] sm:$0xff]  ;;  %v708_v9 = vpack.c.bf16 %v77_v6, %v74_v4  ;;  %v82_v12 = vld [vmem:[#allocation5 + $0x50] sm:$0xff] }
  0x3b   :  { %v677_v10 = vpack.c.bf16 %v75_v8, %v72_v7  ;;  %v79_v11 = vld [vmem:[#allocation5 + $0x38] sm:$0xff]  ;;  %v80_v13 = vld [vmem:[#allocation5 + $0x40] sm:$0xff]  ;;  %v78_v16 = vld [vmem:[#allocation5 + $0x30] sm:$0xff] }
  0x3c   :  { %676 = vmatprep.subr.bf16.mxu0 %v675_v5  ;;  %v679_v14 = vpack.c.bf16 %v82_v12, %v79_v11  ;;  %v83_v15 = vld [vmem:[#allocation5 + $0x58] sm:$0xff]  ;;  %v81_v17 = vld [vmem:[#allocation5 + $0x48] sm:$0xff]  ;;  %709 = vmatpush3.bf16.msra.mxu1 %v708_v9  ;;  %v88_v21 = vld [vmem:[#allocation5 + $0x80] sm:$0xff] }
  0x3d   :  { %678 = vmatpush1.bf16.msra.mxu0 %v677_v10  ;;  %v711_v18 = vpack.c.bf16 %v83_v15, %v80_v13  ;;  %v681_v19 = vpack.c.bf16 %v81_v17, %v78_v16  ;;  %v85_v20 = vld [vmem:[#allocation5 + $0x68] sm:$0xff]  ;;  %v86_v22 = vld [vmem:[#allocation5 + $0x70] sm:$0xff]  ;;  %710 = vmatprep.subr.bf16.mxu1 %v916_v0  ;;  %v84_v25 = vld [vmem:[#allocation5 + $0x60] sm:$0xff] }
  0x3e   :  { %680 = vmatprep.subr.bf16.mxu0 %v679_v14  ;;  %v683_v23 = vpack.c.bf16 %v88_v21, %v85_v20  ;;  %v89_v24 = vld [vmem:[#allocation5 + $0x88] sm:$0xff]  ;;  %v87_v26 = vld [vmem:[#allocation5 + $0x78] sm:$0xff]  ;;  %v94_v28 = vld [vmem:[#allocation5 + $0xb0] sm:$0xff] }
  0x3f   :  { %v91_v27 = vld [vmem:[#allocation5 + $0x98] sm:$0xff]  ;;  %v714_v29 = vpack.c.bf16 %v89_v24, %v86_v22  ;;  %v685_v30 = vpack.c.bf16 %v87_v26, %v84_v25  ;;  %v92_v31 = vld [vmem:[#allocation5 + $0xa0] sm:$0xff]  ;;  %v90_v34 = vld [vmem:[#allocation5 + $0x90] sm:$0xff] }
  0x40   :  { %712 = vmatpush3.bf16.msra.mxu1 %v711_v18  ;;  %v687_v32 = vpack.c.bf16 %v94_v28, %v91_v27  ;;  %v95_v33 = vld [vmem:[#allocation5 + $0xb8] sm:$0xff]  ;;  %v93_v35 = vld [vmem:[#allocation5 + $0xa8] sm:$0xff]  ;;  %v100_v37 = vld [vmem:[#allocation5 + $0xe0] sm:$0xff] }
  0x41   :  { %682 = vmatpush1.bf16.msra.mxu0 %v681_v19  ;;  %713 = vmatprep.subr.bf16.mxu1 %v916_v0  ;;  %v97_v36 = vld [vmem:[#allocation5 + $0xc8] sm:$0xff]  ;;  %v717_v38 = vpack.c.bf16 %v95_v33, %v92_v31  ;;  %v689_v39 = vpack.c.bf16 %v93_v35, %v90_v34  ;;  %v98_v40 = vld [vmem:[#allocation5 + $0xd0] sm:$0xff]  ;;  %v96_v43 = vld [vmem:[#allocation5 + $0xc0] sm:$0xff] }
  0x42   :  { %684 = vmatprep.subr.bf16.mxu0 %v683_v23  ;;  %v691_v41 = vpack.c.bf16 %v100_v37, %v97_v36  ;;  %v101_v42 = vld [vmem:[#allocation5 + $0xe8] sm:$0xff]  ;;  %v99_v44 = vld [vmem:[#allocation5 + $0xd8] sm:$0xff]  ;;  %v106_v46 = vld [vmem:[#allocation5 + $0x110] sm:$0xff] }
  0x43   :  { %v103_v45 = vld [vmem:[#allocation5 + $0xf8] sm:$0xff]  ;;  %v720_v47 = vpack.c.bf16 %v101_v42, %v98_v40  ;;  %v693_v48 = vpack.c.bf16 %v99_v44, %v96_v43  ;;  %v104_v49 = vld [vmem:[#allocation5 + $0x100] sm:$0xff]  ;;  %v102_v52 = vld [vmem:[#allocation5 + $0xf0] sm:$0xff] }
  0x44   :  { %715 = vmatpush3.bf16.msra.mxu1 %v714_v29  ;;  %v695_v50 = vpack.c.bf16 %v106_v46, %v103_v45  ;;  %v107_v51 = vld [vmem:[#allocation5 + $0x118] sm:$0xff]  ;;  %v105_v53 = vld [vmem:[#allocation5 + $0x108] sm:$0xff]  ;;  %v112_v55 = vld [vmem:[#allocation5 + $0x140] sm:$0xff] }
  0x45   :  { %686 = vmatpush1.bf16.msra.mxu0 %v685_v30  ;;  %716 = vmatprep.subr.bf16.mxu1 %v916_v0  ;;  %v109_v54 = vld [vmem:[#allocation5 + $0x128] sm:$0xff]  ;;  %v723_v56 = vpack.c.bf16 %v107_v51, %v104_v49  ;;  %v697_v57 = vpack.c.bf16 %v105_v53, %v102_v52  ;;  %v110_v58 = vld [vmem:[#allocation5 + $0x130] sm:$0xff]  ;;  %v108_v61 = vld [vmem:[#allocation5 + $0x120] sm:$0xff] }
  0x46   :  { %688 = vmatprep.subr.bf16.mxu0 %v687_v32  ;;  %v699_v59 = vpack.c.bf16 %v112_v55, %v109_v54  ;;  %v113_v60 = vld [vmem:[#allocation5 + $0x148] sm:$0xff]  ;;  %v111_v62 = vld [vmem:[#allocation5 + $0x138] sm:$0xff]  ;;  %v118_v2 = vld [vmem:[#allocation5 + $0x170] sm:$0xff] }
  0x47   :  { %v115_v63 = vld [vmem:[#allocation5 + $0x158] sm:$0xff]  ;;  %v726_v3 = vpack.c.bf16 %v113_v60, %v110_v58  ;;  %v701_v4 = vpack.c.bf16 %v111_v62, %v108_v61  ;;  %v116_v5 = vld [vmem:[#allocation5 + $0x160] sm:$0xff]  ;;  %v114_v8 = vld [vmem:[#allocation5 + $0x150] sm:$0xff] }
  0x48   :  { %718 = vmatpush3.bf16.msra.mxu1 %v717_v38  ;;  %v703_v6 = vpack.c.bf16 %v118_v2, %v115_v63  ;;  %v119_v7 = vld [vmem:[#allocation5 + $0x178] sm:$0xff]  ;;  %v117_v9 = vld [vmem:[#allocation5 + $0x168] sm:$0xff]  ;;  %v381_v10 = vld [vmem:[#allocation7 + $0x80] sm:$0xff] }
  0x49   :  { %690 = vmatpush1.bf16.msra.mxu0 %v689_v39  ;;  %719 = vmatprep.subr.bf16.mxu1 %v916_v0  ;;  %v382_v11 = vld [vmem:[#allocation7 + $0x88] sm:$0xff]  ;;  %v729_v12 = vpack.c.bf16 %v119_v7, %v116_v5  ;;  %v705_v13 = vpack.c.bf16 %v117_v9, %v114_v8  ;;  %v365_v15 = vld [vmem:[#allocation7] sm:$0xff]  ;;  %v383_v17 = vld [vmem:[#allocation7 + $0x90] sm:$0xff] }
  0x4a   :  { %692 = vmatprep.subr.bf16.mxu0 %v691_v41  ;;  %v731_v14 = vpack.c.bf16 %v382_v11, %v381_v10  ;;  %v366_v16 = vld [vmem:[#allocation7 + $0x8] sm:$0xff]  ;;  %v384_v18 = vld [vmem:[#allocation7 + $0x98] sm:$0xff]  ;;  %v367_v22 = vld [vmem:[#allocation7 + $0x10] sm:$0xff] }
  0x4b   :  { %v65_v19 = vld [vmem:[#allocation2] sm:$0xff]  ;;  %v733_v20 = vpack.c.bf16 %v366_v16, %v365_v15  ;;  %v735_v21 = vpack.c.bf16 %v384_v18, %v383_v17  ;;  %v368_v23 = vld [vmem:[#allocation7 + $0x18] sm:$0xff]  ;;  %v385_v24 = vld [vmem:[#allocation7 + $0xa0] sm:$0xff] }
  0x4c   :  { %721 = vmatpush3.bf16.msra.mxu1 %v720_v47  ;;  %v386_v25 = vld [vmem:[#allocation7 + $0xa8] sm:$0xff]  ;;  %v737_v26 = vpack.c.bf16 %v368_v23, %v367_v22  ;;  %v369_v28 = vld [vmem:[#allocation7 + $0x20] sm:$0xff]  ;;  %v387_v30 = vld [vmem:[#allocation7 + $0xb0] sm:$0xff] }
  0x4d   :  { %694 = vmatpush1.bf16.msra.mxu0 %v693_v48  ;;  %722 = vmatprep.subr.bf16.mxu1 %v916_v0  ;;  %v739_v27 = vpack.c.bf16 %v386_v25, %v385_v24  ;;  %v370_v29 = vld [vmem:[#allocation7 + $0x28] sm:$0xff]  ;;  %v388_v31 = vld [vmem:[#allocation7 + $0xb8] sm:$0xff]  ;;  %v371_v35 = vld [vmem:[#allocation7 + $0x30] sm:$0xff] }
  0x4e   :  { %696 = vmatprep.subr.bf16.mxu0 %v695_v50  ;;  %v67_v32 = vld [vmem:[#allocation2 + $0x10] sm:$0xff]  ;;  %v741_v33 = vpack.c.bf16 %v370_v29, %v369_v28  ;;  %v743_v34 = vpack.c.bf16 %v388_v31, %v387_v30  ;;  %v389_v37 = vld [vmem:[#allocation7 + $0xc0] sm:$0xff]  ;;  %v390_v38 = vld [vmem:[#allocation7 + $0xc8] sm:$0xff] }
  0x4f   :  { %v372_v36 = vld [vmem:[#allocation7 + $0x38] sm:$0xff]  ;;  %v68_v39 = vld [vmem:[#allocation2 + $0x18] sm:$0xff]  ;;  %v747_v41 = vpack.c.bf16 %v390_v38, %v389_v37  ;;  %v374_v43 = vld [vmem:[#allocation7 + $0x48] sm:$0xff] }
  0x50   :  { %724 = vmatpush3.bf16.msra.mxu1 %v723_v56  ;;  %v745_v40 = vpack.c.bf16 %v372_v36, %v371_v35  ;;  %v373_v42 = vld [vmem:[#allocation7 + $0x40] sm:$0xff]  ;;  %v391_v44 = vld [vmem:[#allocation7 + $0xd0] sm:$0xff]  ;;  %v392_v45 = vld [vmem:[#allocation7 + $0xd8] sm:$0xff] }
  0x51   :  { %698 = vmatpush1.bf16.msra.mxu0 %v697_v57  ;;  %725 = vmatprep.subr.bf16.mxu1 %v916_v0  ;;  %v69_v46 = vld [vmem:[#allocation2 + $0x20] sm:$0xff]  ;;  %v749_v47 = vpack.c.bf16 %v374_v43, %v373_v42  ;;  %v751_v48 = vpack.c.bf16 %v392_v45, %v391_v44  ;;  %v375_v49 = vld [vmem:[#allocation7 + $0x50] sm:$0xff]  ;;  %v376_v50 = vld [vmem:[#allocation7 + $0x58] sm:$0xff] }
  0x52   :  { %700 = vmatprep.subr.bf16.mxu0 %v699_v59  ;;  %v393_v51 = vld [vmem:[#allocation7 + $0xe0] sm:$0xff]  ;;  %v394_v52 = vld [vmem:[#allocation7 + $0xe8] sm:$0xff]  ;;  %v70_v53 = vld [vmem:[#allocation2 + $0x28] sm:$0xff]  ;;  %v753_v54 = vpack.c.bf16 %v376_v50, %v375_v49 }
  0x53   :  { %v755_v55 = vpack.c.bf16 %v394_v52, %v393_v51  ;;  %v71_v56 = vld [vmem:[#allocation2 + $0x30] sm:$0xff]  ;;  %v377_v57 = vld [vmem:[#allocation7 + $0x60] sm:$0xff]  ;;  %v378_v58 = vld [vmem:[#allocation7 + $0x68] sm:$0xff] }
  0x54   :  { %727 = vmatpush3.bf16.msra.mxu1 %v726_v3  ;;  %v757_v59 = vpack.c.bf16 %v378_v58, %v377_v57  ;;  %v395_v60 = vld [vmem:[#allocation7 + $0xf0] sm:$0xff]  ;;  %v396_v61 = vld [vmem:[#allocation7 + $0xf8] sm:$0xff]  ;;  %v120_v7 = vld [vmem:[%s1092_s2] sm:$0x7]  ;;  %s919_s2 = smov [#allocation8]  }
  0x55   :  { %702 = vmatpush1.bf16.msra.mxu0 %v701_v4  ;;  %728 = vmatprep.subr.bf16.mxu1 %v916_v0  ;;  %v66_v0 = vld [vmem:[#allocation2 + $0x8] sm:$0xff]  ;;  %v759_v62 = vpack.c.bf16 %v396_v61, %v395_v60  ;;  %v380_v2 = vld [vmem:[#allocation7 + $0x78] sm:$0xff]  ;;  %s516_s12 = sshll.u32 %s919_s2, 4  ;;  %s517_s12 = int_to_ptr.vmem [resolvable:$true] %s516_s12 }
  0x56   :  { %704 = vmatprep.subr.bf16.mxu0 %v703_v6  ;;  %v379_v63 = vld [vmem:[#allocation7 + $0x70] sm:$0xff]  ;;  %s857_s13 = scalar_lea.vmem %s517_s12, 896  ;;  %p862_p11 = scmp.lt.s32.totalorder %s517_s12, %s517_s12 }
  0x57   :  { %v761_v3 = vpack.c.bf16 %v380_v2, %v379_v63  ;;  %p858_p10 = scmp.ne.s32.totalorder %s517_s12, %s857_s13  ;;  %p863_p12 = scmp.lt.s32.totalorder %s857_s13, %s857_s13 }
  0x58   :  { %730 = vmatpush3.bf16.msra.mxu1 %v729_v12 }
  0x59   :  { %706 = vmatpush1.bf16.msra.mxu0 %v705_v13  ;;  %763 = vmatprep.subr.bf16.mxu1 %v731_v14  ;;  %p864_p13 = por %p863_p12, %p862_p11 }
  0x5a   :  { %732 = vmatprep.subr.bf16.mxu0 %v731_v14 }
  0x5b   :  { %655 = vmatmul.mubr.f32.vlgmr.msra.gmra.mrb[0].mxu1 %v65_v19  ;;  %p865_p0 = pnand %p864_p13, %p858_p10 }
  0x5c   :  { %202 = vmatmul.mubr.f32.vlgmr.msra.gmra.mrb[0].mxu0 %v65_v19  ;;  %657 = vmatprep.mubr.msk.f32.mxu1 %vm917_vm0, %v918_v1 }
  0x5d   :  { %207 = vmatprep.mubr.f32.mxu0 %v918_v1  ;;  %734 = vmatpush3.bf16.msra.mxu0 %v733_v20 }
  0x5e   :  { %771 = vmatpush3.bf16.msra.mxu1 %v733_v20  ;;  %736 = vmatprep.subr.bf16.mxu0 %v735_v21 }
  0x5f   :  { %764 = vmatprep.subr.bf16.mxu1 %v735_v21  ;;  %658 = vmatmul.mubr.f32.gmra.mrb[2].mxu1 %v66_v0 }
  0x60   :  { %208 = vmatmul.mubr.f32.gmra.mrb[2].mxu0 %v66_v0  ;;  %660 = vmatprep.mubr.msk.f32.mxu1 %vm917_vm0, %v918_v1 }
  0x61   :  { %213 = vmatprep.mubr.f32.mxu0 %v918_v1  ;;  %738 = vmatpush3.bf16.msra.mxu0 %v737_v26 }
  0x62   :  { %772 = vmatpush3.bf16.msra.mxu1 %v737_v26  ;;  %740 = vmatprep.subr.bf16.mxu0 %v739_v27 }
  0x63   :  { %765 = vmatprep.subr.bf16.mxu1 %v739_v27  ;;  %661 = vmatmul.mubr.f32.gmra.mrb[4].mxu1 %v67_v32 }
  0x64   :  { %214 = vmatmul.mubr.f32.gmra.mrb[4].mxu0 %v67_v32  ;;  %663 = vmatprep.mubr.msk.f32.mxu1 %vm917_vm0, %v918_v1 }
  0x65   :  { %219 = vmatprep.mubr.f32.mxu0 %v918_v1  ;;  %742 = vmatpush3.bf16.msra.mxu0 %v741_v33 }
  0x66   :  { %773 = vmatpush3.bf16.msra.mxu1 %v741_v33  ;;  %744 = vmatprep.subr.bf16.mxu0 %v743_v34 }
  0x67   :  { %766 = vmatprep.subr.bf16.mxu1 %v743_v34  ;;  %664 = vmatmul.mubr.f32.gmra.mrb[6].mxu1 %v68_v39 }
  0x68   :  { %220 = vmatmul.mubr.f32.gmra.mrb[6].mxu0 %v68_v39  ;;  %666 = vmatprep.mubr.msk.f32.mxu1 %vm917_vm0, %v918_v1 }
  0x69   :  { %225 = vmatprep.mubr.f32.mxu0 %v918_v1  ;;  %746 = vmatpush3.bf16.msra.mxu0 %v745_v40 }
  0x6a   :  { %774 = vmatpush3.bf16.msra.mxu1 %v745_v40  ;;  %748 = vmatprep.subr.bf16.mxu0 %v747_v41 }
  0x6b   :  { %767 = vmatprep.subr.bf16.mxu1 %v747_v41  ;;  %667 = vmatmul.mubr.f32.gmra.mrb[8].mxu1 %v69_v46 }
  0x6c   :  { %226 = vmatmul.mubr.f32.gmra.mrb[8].mxu0 %v69_v46  ;;  %669 = vmatprep.mubr.msk.f32.mxu1 %vm917_vm0, %v918_v1 }
  0x6d   :  { %231 = vmatprep.mubr.f32.mxu0 %v918_v1  ;;  %750 = vmatpush3.bf16.msra.mxu0 %v749_v47 }
  0x6e   :  { %775 = vmatpush3.bf16.msra.mxu1 %v749_v47  ;;  %752 = vmatprep.subr.bf16.mxu0 %v751_v48 }
  0x6f   :  { %768 = vmatprep.subr.bf16.mxu1 %v751_v48  ;;  %670 = vmatmul.mubr.f32.gmra.mrb[10].mxu1 %v70_v53 }
  0x70   :  { %232 = vmatmul.mubr.f32.gmra.mrb[10].mxu0 %v70_v53  ;;  %672 = vmatprep.mubr.msk.f32.mxu1 %vm917_vm0, %v918_v1 }
  0x71   :  { %237 = vmatprep.mubr.f32.mxu0 %v918_v1  ;;  %754 = vmatpush3.bf16.msra.mxu0 %v753_v54  ;;  %v122_v1 = vlaneseq }
  0x72   :  { %776 = vmatpush3.bf16.msra.mxu1 %v753_v54  ;;  %756 = vmatprep.subr.bf16.mxu0 %v755_v55 }
  0x73   :  { %769 = vmatprep.subr.bf16.mxu1 %v755_v55  ;;  %673 = vmatmul.mubr.f32.gmra.mrb[12].mxu1 %v71_v56  ;;  %v123_v4 = vshrl.u32 %v122_v1, 7 }
  0x74   :  { %238 = vmatmul.mubr.f32.gmra.mrb[12].mxu0 %v71_v56 }
  0x75   :  { %758 = vmatpush3.bf16.msra.mxu0 %v757_v59  ;;  %v132_v5 = vsub.s32 2, %v123_v4  ;;  %v124_v6 = vsub.s32 0, %v123_v4  ;;  %v128_v8 = vsub.s32 1, %v123_v4 }
  0x76   :  { %777 = vmatpush3.bf16.msra.mxu1 %v757_v59  ;;  %760 = vmatprep.subr.bf16.mxu0 %v759_v62 }
  0x77   :  { %770 = vmatprep.subr.bf16.mxu1 %v759_v62  ;;  %v1030_v9 = vrot.slane %v120_v7, %v132_v5  ;;  %v1032_v10 = vrot.slane %v120_v7, %v124_v6  ;;  %v1034_v11 = vrot.slane %v120_v7, %v128_v8 }
  0x79   :  { %762 = vmatpush3.bf16.msra.mxu0 %v761_v3 }
  0x7a   :  { %778 = vmatpush3.bf16.msra.mxu1 %v761_v3 }
 0x12e   :  { %v310_v12 = vpop.f32.mrb[0].mxu1 }
 0x12f   :  { %v203_v13 = vpop.f32.mrb[0].mxu0  ;;  %v311_v14 = vadd.f32 %v310_v12, %v1030_v9  ;;  %v656_v16 = vpop.f32.mrb[1].mxu1 }
 0x130   :  { %v204_v15 = vadd.f32 %v203_v13, %v1032_v10  ;;  %v205_v17 = vpop.f32.mrb[1].mxu0 }
 0x131   :  { %v206_v18 = vadd.f32 %v205_v17, %v1034_v11  ;;  %v352_v19 = vmax.f32 %v311_v14, 0.0 }
 0x132   :  { %344 = vst [vmem:[#allocation8] sm:$0xff] %v204_v15  ;;  %v315_v21 = vpop.f32.mrb[2].mxu1 }
 0x133   :  { %v351_v20 = vmax.f32 %v206_v18, 0.0  ;;  %v209_v22 = vpop.f32.mrb[2].mxu0  ;;  %v316_v23 = vadd.f32 %v315_v21, %v1030_v9  ;;  %v659_v25 = vpop.f32.mrb[3].mxu1  ;;  %468 = vmatprep.mubr.f32.mxu0 %v352_v19 }
 0x134   :  { %v210_v24 = vadd.f32 %v209_v22, %v1032_v10  ;;  %v211_v0 = vpop.f32.mrb[3].mxu0 }
 0x135   :  { %v212_v26 = vadd.f32 %v211_v0, %v1034_v11  ;;  %469 = vmatmul.mubr.f32.vlgmr.msra.gmra.mrb[14].mxu0 %v351_v20  ;;  %v354_v27 = vmax.f32 %v316_v23, 0.0 }
 0x136   :  { %345 = vst [vmem:[#allocation8 + $0x8] sm:$0xff] %v210_v24  ;;  %v320_v29 = vpop.f32.mrb[4].mxu1 }
 0x137   :  { %v353_v28 = vmax.f32 %v212_v26, 0.0  ;;  %v215_v30 = vpop.f32.mrb[4].mxu0  ;;  %v321_v31 = vadd.f32 %v320_v29, %v1030_v9  ;;  %v662_v33 = vpop.f32.mrb[5].mxu1  ;;  %473 = vmatprep.mubr.f32.mxu0 %v354_v27 }
 0x138   :  { %v216_v32 = vadd.f32 %v215_v30, %v1032_v10  ;;  %v217_v34 = vpop.f32.mrb[5].mxu0 }
 0x139   :  { %v218_v35 = vadd.f32 %v217_v34, %v1034_v11  ;;  %474 = vmatmul.mubr.f32.gmra.mrb[16].mxu0 %v353_v28  ;;  %v356_v36 = vmax.f32 %v321_v31, 0.0 }
 0x13a   :  { %346 = vst [vmem:[#allocation8 + $0x10] sm:$0xff] %v216_v32  ;;  %v325_v38 = vpop.f32.mrb[6].mxu1 }
 0x13b   :  { %v355_v37 = vmax.f32 %v218_v35, 0.0  ;;  %v221_v39 = vpop.f32.mrb[6].mxu0  ;;  %v326_v40 = vadd.f32 %v325_v38, %v1030_v9  ;;  %v665_v42 = vpop.f32.mrb[7].mxu1  ;;  %478 = vmatprep.mubr.f32.mxu0 %v356_v36 }
 0x13c   :  { %v222_v41 = vadd.f32 %v221_v39, %v1032_v10  ;;  %v223_v43 = vpop.f32.mrb[7].mxu0 }
 0x13d   :  { %v224_v44 = vadd.f32 %v223_v43, %v1034_v11  ;;  %479 = vmatmul.mubr.f32.gmra.mrb[18].mxu0 %v355_v37  ;;  %v358_v45 = vmax.f32 %v326_v40, 0.0 }
 0x13e   :  { %347 = vst [vmem:[#allocation8 + $0x18] sm:$0xff] %v222_v41  ;;  %v330_v47 = vpop.f32.mrb[8].mxu1 }
 0x13f   :  { %v357_v46 = vmax.f32 %v224_v44, 0.0  ;;  %v227_v48 = vpop.f32.mrb[8].mxu0  ;;  %v331_v49 = vadd.f32 %v330_v47, %v1030_v9  ;;  %v668_v51 = vpop.f32.mrb[9].mxu1  ;;  %483 = vmatprep.mubr.f32.mxu0 %v358_v45 }
 0x140   :  { %v228_v50 = vadd.f32 %v227_v48, %v1032_v10  ;;  %v229_v52 = vpop.f32.mrb[9].mxu0 }
 0x141   :  { %v230_v53 = vadd.f32 %v229_v52, %v1034_v11  ;;  %484 = vmatmul.mubr.f32.gmra.mrb[20].mxu0 %v357_v46  ;;  %v360_v54 = vmax.f32 %v331_v49, 0.0 }
 0x142   :  { %348 = vst [vmem:[#allocation8 + $0x20] sm:$0xff] %v228_v50  ;;  %v335_v56 = vpop.f32.mrb[10].mxu1 }
 0x143   :  { %v359_v55 = vmax.f32 %v230_v53, 0.0  ;;  %v233_v57 = vpop.f32.mrb[10].mxu0  ;;  %v336_v58 = vadd.f32 %v335_v56, %v1030_v9  ;;  %v671_v60 = vpop.f32.mrb[11].mxu1  ;;  %488 = vmatprep.mubr.f32.mxu1 %v360_v54 }
 0x144   :  { %v234_v59 = vadd.f32 %v233_v57, %v1032_v10  ;;  %v235_v61 = vpop.f32.mrb[11].mxu0 }
 0x145   :  { %v236_v62 = vadd.f32 %v235_v61, %v1034_v11  ;;  %489 = vmatmul.mubr.f32.vlgmr.msra.gmra.mrb[14].mxu1 %v359_v55  ;;  %v362_v63 = vmax.f32 %v336_v58, 0.0 }
 0x146   :  { %349 = vst [vmem:[#allocation8 + $0x28] sm:$0xff] %v234_v59  ;;  %v340_v3 = vpop.f32.mrb[12].mxu1 }
 0x147   :  { %v361_v2 = vmax.f32 %v236_v62, 0.0  ;;  %v239_v1 = vpop.f32.mrb[12].mxu0  ;;  %v341_v4 = vadd.f32 %v340_v3, %v1030_v9  ;;  %v674_v6 = vpop.f32.mrb[13].mxu1  ;;  %493 = vmatprep.mubr.f32.mxu1 %v362_v63 }
 0x148   :  { %v240_v5 = vadd.f32 %v239_v1, %v1032_v10  ;;  %v241_v7 = vpop.f32.mrb[13].mxu0 }
 0x149   :  { %v242_v8 = vadd.f32 %v241_v7, %v1034_v11  ;;  %494 = vmatmul.mubr.f32.gmra.mrb[16].mxu1 %v361_v2  ;;  %v364_v12 = vmax.f32 %v341_v4, 0.0 }
 0x14a   :  { %350 = vst [vmem:[#allocation8 + $0x30] sm:$0xff] %v240_v5 }
 0x14b   :  { %v363_v13 = vmax.f32 %v242_v8, 0.0  ;;  %498 = vmatprep.mubr.f32.mxu1 %v364_v12 }
 0x14d   :  { %499 = vmatmul.mubr.f32.gmra.mrb[18].mxu1 %v363_v13 }
 0x14e   :  { %868 = shalt.err (!%p865_p0)
}
 0x14f   :  { %s869_s16 = scalar_lea.hbm %s1095_s5, 896 }
 0x150   :  { %p870_p1 = scmp.ne.s32.totalorder %s1095_s5, %s869_s16  ;;  %p873_p2 = scmp.lt.u32.totalorder %s869_s16, %s1095_s5 }
 0x152   :  { %p875_p3 = pnand %p873_p2, %p870_p1 }
 0x154   :  { %878 = shalt.err (!%p875_p3)
}
 0x155   :  { %522 = dma.vmem_to_hbm [thread:$0]  %s517_s12, 896, %s1095_s5, [#allocation4], %s913_s1, %s913_s1, %s914_s21  }
 0x156   :  { %v545_v10 = vld [vmem:[%s1094_s4] ss:$0 sm:$0xff]  ;;  %s920_s4 = smov [#allocation9]  }
 0x157   :  { %s528_s5 = sshll.u32 %s920_s4, 4  ;;  %s529_s5 = int_to_ptr.vmem [resolvable:$true] %s528_s5 }
 0x158   :  { %s879_s26 = scalar_lea.vmem %s529_s5, 896  ;;  %p884_p5 = scmp.lt.s32.totalorder %s529_s5, %s529_s5 }
 0x159   :  { %p880_p4 = scmp.ne.s32.totalorder %s529_s5, %s879_s26  ;;  %p885_p6 = scmp.lt.s32.totalorder %s879_s26, %s879_s26 }
 0x15b   :  { %p886_p7 = por %p885_p6, %p884_p5 }
 0x15d   :  { %p887_p8 = pnand %p886_p7, %p880_p4 }
 0x208   :  { %v601_v9 = vpop.f32.mrb[14].mxu0 }
 0x209   :  { %v602_v11 = vpop.f32.mrb[15].mxu0 }
 0x20a   :  { %v603_v14 = vadd.f32 %v602_v11, %v601_v9 }
 0x20c   :  { %v471_v15 = vadd.f32 %v603_v14, %v545_v10  ;;  %v604_v16 = vpop.f32.mrb[16].mxu0 }
 0x20d   :  { %v605_v17 = vpop.f32.mrb[17].mxu0 }
 0x20e   :  { %504 = vst [vmem:[#allocation9] sm:$0xff] %v471_v15  ;;  %v606_v18 = vadd.f32 %v605_v17, %v604_v16 }
 0x210   :  { %v476_v19 = vadd.f32 %v606_v18, %v545_v10  ;;  %v607_v20 = vpop.f32.mrb[18].mxu0 }
 0x211   :  { %v608_v21 = vpop.f32.mrb[19].mxu0 }
 0x212   :  { %505 = vst [vmem:[#allocation9 + $0x8] sm:$0xff] %v476_v19  ;;  %v609_v22 = vadd.f32 %v608_v21, %v607_v20 }
 0x214   :  { %v481_v23 = vadd.f32 %v609_v22, %v545_v10  ;;  %v610_v24 = vpop.f32.mrb[20].mxu0 }
 0x215   :  { %v611_v25 = vpop.f32.mrb[21].mxu0 }
 0x216   :  { %506 = vst [vmem:[#allocation9 + $0x10] sm:$0xff] %v481_v23  ;;  %v612_v0 = vadd.f32 %v611_v25, %v610_v24 }
 0x218   :  { %v486_v26 = vadd.f32 %v612_v0, %v545_v10  ;;  %v613_v27 = vpop.f32.mrb[14].mxu1 }
 0x219   :  { %v614_v28 = vpop.f32.mrb[15].mxu1 }
 0x21a   :  { %507 = vst [vmem:[#allocation9 + $0x18] sm:$0xff] %v486_v26  ;;  %v615_v29 = vadd.f32 %v614_v28, %v613_v27 }
 0x21c   :  { %v491_v30 = vadd.f32 %v615_v29, %v545_v10  ;;  %v616_v31 = vpop.f32.mrb[16].mxu1 }
 0x21d   :  { %v617_v32 = vpop.f32.mrb[17].mxu1 }
 0x21e   :  { %508 = vst [vmem:[#allocation9 + $0x20] sm:$0xff] %v491_v30  ;;  %v618_v33 = vadd.f32 %v617_v32, %v616_v31 }
 0x220   :  { %v496_v34 = vadd.f32 %v618_v33, %v545_v10  ;;  %v619_v35 = vpop.f32.mrb[18].mxu1 }
 0x221   :  { %v620_v36 = vpop.f32.mrb[19].mxu1 }
 0x222   :  { %509 = vst [vmem:[#allocation9 + $0x28] sm:$0xff] %v496_v34  ;;  %v621_v37 = vadd.f32 %v620_v36, %v619_v35 }
 0x224   :  { %v501_v38 = vadd.f32 %v621_v37, %v545_v10 }
 0x226   :  { %510 = vst [vmem:[#allocation9 + $0x30] sm:$0xff] %v501_v38 }
 0x227   :  { %890 = shalt.err (!%p887_p8)
}
 0x228   :  { %s891_s29 = scalar_lea.hbm %s1096_s6, 896 }
 0x229   :  { %p892_p9 = scmp.ne.s32.totalorder %s1096_s6, %s891_s29  ;;  %p895_p10 = scmp.lt.u32.totalorder %s891_s29, %s1096_s6 }
 0x22b   :  { %p897_p11 = pnand %p895_p10, %p892_p9 }
 0x22d   :  { %900 = shalt.err (!%p897_p11)
}
 0x22e   :  { %534 = dma.vmem_to_hbm [thread:$0]  %s529_s5, 896, %s1096_s6, [#allocation10], %s913_s1, %s913_s1, %s914_s21  }
 0x22f   :  { %905 = dma.done.wait [#allocation4], 896  }
 0x230   :  { %906 = vsyncadd [#allocation4], 4294966400 }
 0x231   :  { %907 = dma.done.wait [#allocation10], 896  }
 0x232   :  { %908 = vsyncadd [#allocation10], 4294966400 }
 0x233   :  { %541 = vsyncpa [#allocation3], 1 }
 0x234   :  { %542 = vsyncpa [#allocation6], 1 }
 0x235   :  { %543 = vsyncpa [#allocation4], 1 }
 0x236   :  { %544 = vsyncpa [#allocation10], 1 }

</bundles_post_ra>
